<compile_context>
chip_gen: v5e
topology: v5e:2x2
jax: 0.10.0
libtpu: 0.0.40
codegen_flags: <defaults>
</compile_context>

<pallas_src>
import jax
import jax.numpy as jnp
from jax import lax
from jax.experimental import pallas as pl
from jax.experimental.pallas import tpu as pltpu

# (B, K) x (N, K) -> (B, N): contract last dim of both operands (no batch dims).
_CONTRACT_K = (((1,), (1,)), ((), ()))

_VMEM_LIMIT_BYTES = 32 * 1024 * 1024     # safe scoped limit on v5e / v6e / v7x
_FAST_PATH_BYTES = 2 * 1024 * 1024       # whole problem small enough -> single block
_TILE_BUDGET_BYTES = 8 * 1024 * 1024     # double-buffered x + weight tiles


def _neck_kernel_single(x_ref, w_ref, b_ref, o_ref):
    """Whole problem resident in VMEM: one dot + bias + ReLU, no pl.when."""
    acc = lax.dot_general(
        x_ref[...], w_ref[...], _CONTRACT_K, preferred_element_type=jnp.float32
    )
    o_ref[...] = jnp.maximum(acc + b_ref[...], 0.0).astype(o_ref.dtype)


def _neck_kernel_tiled(x_ref, w_ref, b_ref, o_ref):
    """grid = (N/tn, K/tk).  The f32 output block is resident across the K axis
    and used directly as the accumulator; bias + ReLU on the last K step."""
    k = pl.program_id(1)

    @pl.when(k == 0)
    def _():
        o_ref[...] = jnp.zeros_like(o_ref)

    o_ref[...] += lax.dot_general(
        x_ref[...], w_ref[...], _CONTRACT_K, preferred_element_type=jnp.float32
    )

    @pl.when(k == pl.num_programs(1) - 1)
    def _():
        o_ref[...] = jnp.maximum(o_ref[...] + b_ref[...], 0.0).astype(o_ref.dtype)


def _pick_tn(N):
    # Keep N in one tile unless it is large and cleanly divisible.
    if N > 256 and N % 256 == 0:
        return 256
    return N


def _pick_tk(K, B, tn, budget_bytes=_TILE_BUDGET_BYTES):
    if K % 128 != 0:
        # Full-K block is always legal (block dim == full array dim).
        return K
    best = 128
    tk = 128
    while tk <= K:
        # double-buffered f32 x-tile (B, tk) + weight-tile (tn, tk)
        if K % tk == 0 and 2 * 4 * tk * (B + tn) <= budget_bytes:
            best = tk
        tk += 128
    return best


def dhm_neck(x, weight, bias):
    """x: (B, seq, d_model) f32
       weight: (neck_out, K) f32   (native PyTorch Linear layout, K = seq*d_model)
       bias: (neck_out,) f32
       returns: (B, neck_out) f32 == relu(x.reshape(B, -1) @ weight.T + bias)
    """
    B = x.shape[0]
    x2d = x.reshape(B, -1)                # same semantics as torch .reshape(B, -1)
    K = x2d.shape[1]
    N = weight.shape[0]
    assert weight.shape == (N, K) and bias.shape == (N,)
    # f32 path: the tiled kernel accumulates directly into the f32 output block.
    assert x.dtype == jnp.float32 and weight.dtype == jnp.float32

    b2d = bias.reshape(1, N)
    out_shape = jax.ShapeDtypeStruct((B, N), x.dtype)
    total_bytes = 4 * (x2d.size + weight.size + bias.size + B * N)

    if total_bytes <= _FAST_PATH_BYTES:
        # Single-block fast path: removes all pipeline prologue/epilogue and
        # per-grid-step overhead for small problems (the reference shapes).
        return pl.pallas_call(
            _neck_kernel_single,
            out_shape=out_shape,
            grid_spec=pltpu.PrefetchScalarGridSpec(
                num_scalar_prefetch=0,
                grid=(1,),
                in_specs=[
                    pl.BlockSpec((B, K), lambda i: (0, 0)),   # activations
                    pl.BlockSpec((N, K), lambda i: (0, 0)),   # weight, native layout
                    pl.BlockSpec((1, N), lambda i: (0, 0)),   # bias
                ],
                out_specs=pl.BlockSpec((B, N), lambda i: (0, 0)),
            ),
            compiler_params=pltpu.CompilerParams(
                dimension_semantics=("arbitrary",),
                vmem_limit_bytes=_VMEM_LIMIT_BYTES,
            ),
        )(x2d, weight, b2d)

    # Tiled weight-streaming path.
    tn = _pick_tn(N)
    tk = _pick_tk(K, B, tn)
    grid = (N // tn, K // tk)             # reduction axis (K) last, by convention

    return pl.pallas_call(
        _neck_kernel_tiled,
        out_shape=out_shape,
        grid_spec=pltpu.PrefetchScalarGridSpec(
            num_scalar_prefetch=0,
            grid=grid,
            in_specs=[
                pl.BlockSpec((B, tk), lambda n, k: (0, k)),    # x tile
                pl.BlockSpec((tn, tk), lambda n, k: (n, k)),   # weight tile, (N, K) layout
                pl.BlockSpec((1, tn), lambda n, k: (0, n)),    # bias slice
            ],
            # Output block constant across K -> resident f32 accumulator.
            out_specs=pl.BlockSpec((B, tn), lambda n, k: (0, n)),
        ),
        compiler_params=pltpu.CompilerParams(
            dimension_semantics=("parallel", "arbitrary"),     # N parallel (2nd TC on v7x)
            vmem_limit_bytes=_VMEM_LIMIT_BYTES,
        ),
    )(x2d, weight, b2d)


if __name__ == "__main__":
    def _ref(x, w, b):
        return jnp.maximum(x.reshape(x.shape[0], -1) @ w.T + b, 0.0)

    def _make_inputs(key, batch, seq_len, d_model, neck_out):
        K = d_model * seq_len
        kx, kw, kb = jax.random.split(key, 3)
        bound = 1.0 / jnp.sqrt(jnp.float32(K))
        x = jax.random.normal(kx, (batch, seq_len, d_model), dtype=jnp.float32)
        w = jax.random.uniform(kw, (neck_out, K), jnp.float32, -bound, bound)
        b = jax.random.uniform(kb, (neck_out,), jnp.float32, -bound, bound)
        return x, w, b

    key = jax.random.PRNGKey(0)
    k_small, k_big = jax.random.split(key, 2)

    # 1) Small shapes consistent with the module (hits the single-block fast path):
    #    d_model=32, sequence_length=8, neck_output=32, batch=2.
    x, w, b = _make_inputs(k_small, batch=2, seq_len=8, d_model=32, neck_out=32)
    out = jax.block_until_ready(dhm_neck(x, w, b))
    assert out.shape == (2, 32)
    assert jnp.allclose(out, _ref(x, w, b), atol=1e-5, rtol=1e-5)

    # 2) Larger smoke test exercising the tiled path (parallel N axis + K reduction
    #    with the output block as the accumulator).
    x, w, b = _make_inputs(k_big, batch=8, seq_len=64, d_model=64, neck_out=512)
    out = jax.block_until_ready(dhm_neck(x, w, b))
    assert out.shape == (8, 512)
    assert jnp.allclose(out, _ref(x, w, b), atol=1e-3, rtol=1e-3)

    print("KERNEL_OK")
</pallas_src>

<mosaic_0001>
module attributes {stable_mosaic.version = 11 : i64} {
  func.func @_neck_kernel_single(%arg0: i32, %arg1: memref<2x256xf32, #tpu.memory_space<vmem>>, %arg2: memref<32x256xf32, #tpu.memory_space<vmem>>, %arg3: memref<1x32xf32, #tpu.memory_space<vmem>>, %arg4: memref<2x32xf32, #tpu.memory_space<vmem>>) attributes {dimension_semantics = [#tpu.dimension_semantics<arbitrary>], iteration_bounds = array<i64: 1>, scalar_prefetch = 0 : i64, scratch_operands = 0 : i64, tpu.core_type = #tpu.core_type<tc>, window_params = [{pipeline_mode = #tpu.pipeline_mode<synchronous>, transform_indices = @transform_0, window_bounds = array<i64: 2, 256>}, {pipeline_mode = #tpu.pipeline_mode<synchronous>, transform_indices = @transform_1, window_bounds = array<i64: 32, 256>}, {pipeline_mode = #tpu.pipeline_mode<synchronous>, transform_indices = @transform_2, window_bounds = array<i64: 1, 32>}, {pipeline_mode = #tpu.pipeline_mode<synchronous>, transform_indices = @transform_3, window_bounds = array<i64: 2, 32>}]} {
    %c0 = arith.constant 0 : index
    %c0_0 = arith.constant 0 : index
    %0 = vector.load %arg1[%c0, %c0_0] : memref<2x256xf32, #tpu.memory_space<vmem>>, vector<2x256xf32>
    %c0_1 = arith.constant 0 : index
    %c0_2 = arith.constant 0 : index
    %1 = vector.load %arg2[%c0_1, %c0_2] : memref<32x256xf32, #tpu.memory_space<vmem>>, vector<32x256xf32>
    %cst = arith.constant dense<0.000000e+00> : vector<2x32xf32>
    %2 = tpu.matmul %0, %1, %cst {dimension_numbers = #tpu.dot_dimension_numbers<[1], [1], [0], [0], [0, 0, 1, 0], [], []>} : vector<2x256xf32>, vector<32x256xf32>, vector<2x32xf32> -> vector<2x32xf32>
    %c0_3 = arith.constant 0 : index
    %c0_4 = arith.constant 0 : index
    %3 = vector.load %arg3[%c0_3, %c0_4] : memref<1x32xf32, #tpu.memory_space<vmem>>, vector<1x32xf32>
    %4 = vector.broadcast %3 : vector<1x32xf32> to vector<2x32xf32>
    %5 = arith.addf %2, %4 : vector<2x32xf32>
    %cst_5 = arith.constant 0.000000e+00 : f32
    %6 = vector.broadcast %cst_5 : f32 to vector<2x32xf32>
    %7 = arith.maximumf %5, %6 : vector<2x32xf32>
    %c0_6 = arith.constant 0 : index
    %c0_7 = arith.constant 0 : index
    %8 = vector.load %arg4[%c0_6, %c0_7] : memref<2x32xf32, #tpu.memory_space<vmem>>, vector<2x32xf32>
    tpu.vector_store %arg4[%c0_6, %c0_7], %7 {strides = array<i32>} : memref<2x32xf32, #tpu.memory_space<vmem>>, vector<2x32xf32>,
    return
  }
  func.func @transform_0(%arg0: i32) -> (i32, i32) {
    %c0_i32 = arith.constant 0 : i32
    %c0_i32_0 = arith.constant 0 : i32
    %c0_i32_1 = arith.constant 0 : i32
    return %c0_i32, %c0_i32_0 : i32, i32
  }
  func.func @transform_1(%arg0: i32) -> (i32, i32) {
    %c0_i32 = arith.constant 0 : i32
    %c0_i32_0 = arith.constant 0 : i32
    %c0_i32_1 = arith.constant 0 : i32
    return %c0_i32, %c0_i32_0 : i32, i32
  }
  func.func @transform_2(%arg0: i32) -> (i32, i32) {
    %c0_i32 = arith.constant 0 : i32
    %c0_i32_0 = arith.constant 0 : i32
    %c0_i32_1 = arith.constant 0 : i32
    return %c0_i32, %c0_i32_0 : i32, i32
  }
  func.func @transform_3(%arg0: i32) -> (i32, i32) {
    %c0_i32 = arith.constant 0 : i32
    %c0_i32_0 = arith.constant 0 : i32
    %c0_i32_1 = arith.constant 0 : i32
    return %c0_i32, %c0_i32_0 : i32, i32
  }
}

</mosaic_0001>

<bundles_post_ra>
// kernel: tpu_custom_call.1
= control target key start
LH: loop header
LB: loop body
LE: loop exit
PB: predicated region body
PF: predicated region fallthrough
CT: control target
= control target key end

     0   :  { %8 = vsyncpa [#allocation3], 0  ;;  %s246_s0 = inlined_call_operand.hbm [shape: f32[2,256], index: 0, kind: input, shape index: {}]   ;;  %s247_s1 = inlined_call_operand.hbm [shape: f32[32,256], index: 1, kind: input, shape index: {}]   ;;  %s248_s2 = inlined_call_operand.vmem [shape: f32[1,32], index: 2, kind: input, shape index: {}]   ;;  %s249_s3 = inlined_call_operand.hbm [shape: f32[2,32], index: 3, kind: output, shape index: {}]  }
   0x1   :  { %9 = vsyncpa [#allocation6], 0 }
   0x2   :  { %10 = vsyncpa [#allocation4], 0  ;;  %s16_s14 = sshll.u32 %s246_s0, 4  ;;  %s209_s15 = smov [#allocation2]   ;;  %s17_s14 = int_to_ptr.hbm [resolvable:$true] %s16_s14 }
   0x3   :  { %s18_s16 = sshll.u32 %s209_s15, 4  ;;  %s26_s19 = sshll.u32 %s247_s1, 4  ;;  %s19_s16 = int_to_ptr.vmem [resolvable:$true] %s18_s16  ;;  %s27_s19 = int_to_ptr.hbm [resolvable:$true] %s26_s19 }
   0x4   :  { %21 = dma.hbm_to_vmem [thread:$0]  %s17_s14, 64, %s19_s16, [#allocation3]  }
   0x5   :  { %s210_s20 = smov [#allocation5]   ;;  %s211_s22 = smov 256  }
   0x6   :  { %s28_s21 = sshll.u32 %s210_s20, 4  ;;  %s212_s23 = smov 16   ;;  %s29_s21 = int_to_ptr.vmem [resolvable:$true] %s28_s21 }
   0x7   :  { %34 = dma.hbm_to_vmem [thread:$0]  %s27_s19, 1024, %s29_s21, [#allocation6], %s211_s22, %s211_s22, %s212_s23  }
   0x8   :  { %203 = dma.done.wait [#allocation3], 64  }
   0x9   :  { %204 = vsyncadd [#allocation3], 4294967232 }
   0xa   :  { %205 = dma.done.wait [#allocation6], 1024  }
   0xb   :  { %206 = vsyncadd [#allocation6], 4294966272  ;;  %v52_v0 = vld [vmem:[#allocation5 + $0x30] sm:$0xff]  ;;  %v53_v1 = vld [vmem:[#allocation5 + $0x38] sm:$0xff]  ;;  %s213_s24 = smov [#allocation7]   ;;  %s114_s28 = sshll.u32 %s249_s3, 4  ;;  %s115_s28 = int_to_ptr.hbm [resolvable:$true] %s114_s28 }
   0xc   :  { %76 = vmatpush.xpose.msra.mxu0 %v52_v0  ;;  %96 = vmatpush.xpose.msra.mxu1 %v53_v1  ;;  %v50_v2 = vld [vmem:[#allocation5 + $0x20] sm:$0xff]  ;;  %v51_v3 = vld [vmem:[#allocation5 + $0x28] sm:$0xff]  ;;  %v45_v4 = vld [vmem:[#allocation2] sm:$0xf]  ;;  %s112_s25 = sshll.u32 %s213_s24, 4  ;;  %vm105_vm0 = vcmask 254976   ;;  %s113_s25 = int_to_ptr.vmem [resolvable:$true] %s112_s25 }
   0xd   :  { %59 = vst [vmem:[#allocation1] ss:$4 sm:$0xff] %v45_v4  ;;  %v48_v5 = vld [vmem:[#allocation5 + $0x10] sm:$0xff]  ;;  %v49_v6 = vld [vmem:[#allocation5 + $0x18] sm:$0xff]  ;;  %v46_v7 = vld [vmem:[#allocation5] sm:$0xff] }
   0xe   :  { %v47_v8 = vld [vmem:[#allocation5 + $0x8] sm:$0xff]  ;;  %v130_v11 = vld [vmem:[%s248_s2] ss:$0 sm:$0xff] }
  0x10   :  { %77 = vmatpush.xpose.msra.mxu0 %v50_v2  ;;  %97 = vmatpush.xpose.msra.mxu1 %v51_v3 }
  0x14   :  { %78 = vmatpush.xpose.msra.mxu0 %v48_v5  ;;  %98 = vmatpush.xpose.msra.mxu1 %v49_v6  ;;  %v60_v9 = vld.sshfl [vmem:[#allocation1] sm:$0xff pattern:$0x73625140]  ;;  %v61_v10 = vld.sshfl [vmem:[#allocation1 + $0x8] sm:$0xff pattern:$0x73625140] }
  0x18   :  { %79 = vmatpush.xpose.msra.mxu0 %v46_v7  ;;  %99 = vmatpush.xpose.msra.mxu1 %v47_v8 }
  0x1b   :  { %80 = vmatmul.f32.vlgmr.msra.gmra.mxu0 %v60_v9  ;;  %100 = vmatmul.f32.vlgmr.msra.gmra.mxu1 %v61_v10 }
  0x98   :  { %v81_v12 = vpop.f32.mrf.mxu0  ;;  %v101_v13 = vpop.f32.mrf.mxu1 }
  0x99   :  { %v82_v14 = vadd.f32 %v130_v11, %v81_v12 }
  0x9b   :  { %v102_v15 = vadd.f32 %v101_v13, %v82_v14 }
  0x9d   :  { %v104_v16 = vmax.f32 %v102_v15, 0.0 }
  0x9f   :  { %106 = vst.msk [vmem:[#allocation7] sm:$0x3] %vm105_vm0, %v104_v16 }
  0xa0   :  { %117 = dma.vmem_to_hbm [thread:$0]  %s113_s25, 32, %s115_s28, [#allocation4]  }
  0xa1   :  { %207 = dma.done.wait [#allocation4], 32  }
  0xa2   :  { %208 = vsyncadd [#allocation4], 4294967264 }
  0xa3   :  { %122 = vsyncpa [#allocation3], 1 }
  0xa4   :  { %123 = vsyncpa [#allocation6], 1 }
  0xa5   :  { %124 = vsyncpa [#allocation4], 1 }

</bundles_post_ra>
